<compile_context>
chip_gen: v6e
topology: v6e:2x2x1
jax: 0.10.0
libtpu: 0.0.40
codegen_flags: <defaults>
</compile_context>

<pallas_src>
import functools

import jax
import jax.numpy as jnp
import numpy as np
from jax.experimental import pallas as pl
from jax.experimental.pallas import tpu as pltpu


def _round_up(x, m):
    return ((x + m - 1) // m) * m


_POOL_BLOCK_BYTES = 4 * 1024 * 1024     # target VMEM bytes of one pooled-row input block
_RESIDENT_W_BYTES = 8 * 1024 * 1024     # keep the conv weight resident below this size
_VMEM_LIMIT_BYTES = 48 * 1024 * 1024    # explicit scoped-VMEM request (< v7x's 64 MiB/TC)


# ----------------------------- max-pool kernel ------------------------------


def _maxpool_kernel(x_ref, halo_ref, o_ref, *, stride, H, Ho):
    """MaxPool2d(kernel_size=stride+1, stride=stride, padding=stride//2), one H-block.

    Layout (H, W, N, C): both pooled axes are untiled leading dims, so every
    reshape/slice below is address math on whole (N, C) tiles.

      x_ref:    (s*tHo, W, N, C)  input rows [b*s*tHo, (b+1)*s*tHo)
      halo_ref: (s,     W, N, C)  the s input rows just above the block (last p used)
      o_ref:    (tHo, Wo, N, C)

    For pooled row r the window is input rows [r*s - p, r*s + s] (global), i.e.
      max( first s-p+1 rows of group r , last p rows of group r-1 )
    where group r = main rows [r*s, (r+1)*s) and "group -1" is the halo / -inf pad.
    """
    s = stride
    p = s // 2                               # >= 1 since stride > 1
    tHo, Wo, N, C = o_ref.shape
    W = x_ref.shape[1]
    b = pl.program_id(0)

    main = x_ref[...]                                          # (s*tHo, W, N, C)
    g = main.reshape(tHo, s, W, N, C)
    top = jnp.max(g[:, : s - p + 1], axis=1)                   # rows r*s .. r*s+s-p
    bot = jnp.max(g[:, s - p:], axis=1)                        # rows r*s+s-p .. r*s+s-1

    # Rows just above the block: last p rows of the halo; -inf padding for block 0.
    halo_top = jnp.max(halo_ref[s - p:], axis=0, keepdims=True)          # (1, W, N, C)
    halo_top = jnp.where(b == 0, jnp.full_like(halo_top, -jnp.inf), halo_top)
    if tHo == 1:
        below = halo_top
    else:
        below = jnp.concatenate([halo_top, bot[: tHo - 1]], axis=0)      # (tHo, W, N, C)
    hp = jnp.maximum(top, below)                               # pooled over H

    def wpool(v):
        # v: (rows, W, N, C) -> (rows, Wo, N, C); same window decomposition along W.
        rows = v.shape[0]
        n_full = Wo if Wo * s <= W else Wo - 1                 # cols handled via group reshape
        pieces = []
        if n_full > 0:
            body = v[:, : n_full * s].reshape(rows, n_full, s, N, C)
            a = jnp.max(body[:, :, : s - p + 1], axis=2)
            bw = jnp.max(body[:, :, s - p:], axis=2)
            left = jnp.full((rows, 1, N, C), -jnp.inf, v.dtype)
            if n_full == 1:
                bshift = left
            else:
                bshift = jnp.concatenate([left, bw[:, : n_full - 1]], axis=1)
            pieces.append(jnp.maximum(a, bshift))
        if n_full < Wo:
            # Last output column: its window runs past W; clip with static slices.
            lo = max((Wo - 1) * s - p, 0)
            hi = min(W, (Wo - 1) * s + s - p + 1)
            pieces.append(jnp.max(v[:, lo:hi], axis=1, keepdims=True))
        return pieces[0] if len(pieces) == 1 else jnp.concatenate(pieces, axis=1)

    o_ref[...] = wpool(hp)

    # Bottom boundary: at most ONE pooled row (the globally last) can have window
    # rows >= H (reading boundary-block garbage); re-do just that row with the
    # statically clipped window. No-op (not even traced) when H divides cleanly.
    overrun = Ho * s - p + 1 - H
    if overrun > 0:
        b_last = (Ho - 1) // tHo
        r_last = (Ho - 1) % tHo
        keep = s - p + 1 - overrun            # >= 1 valid rows in the top window part

        @pl.when(b == b_last)
        def _():
            top_fix = jnp.max(g[r_last:r_last + 1, :keep], axis=1)
            fixed = jnp.maximum(top_fix, below[r_last:r_last + 1])
            o_ref[r_last:r_last + 1] = wpool(fixed)


def maxpool2d_hwnc(x_hwnc, stride):
    """nn.MaxPool2d(kernel_size=stride+1, stride=stride, padding=stride//2).

    Input (H, W, N, C), output (Ho, Wo, N, C). Requires a floating dtype (the implicit
    padding value is -inf, matching PyTorch's max-pool padding semantics).
    """
    if not jnp.issubdtype(x_hwnc.dtype, jnp.floating):
        raise TypeError("maxpool2d_hwnc requires a floating dtype (pads with -inf)")
    s = int(stride)
    k = s + 1
    p = s // 2
    H, W, N, C = x_hwnc.shape
    Ho = (H + 2 * p - k) // s + 1
    Wo = (W + 2 * p - k) // s + 1

    # Pooled-row block size: ~_POOL_BLOCK_BYTES per input block (accounting for the
    # (8, 128) padding of the tiled (N, C) dims), at least 2 grid steps when Ho >= 2
    # (so the "parallel" axis splits across v7x's two TensorCores), and never larger
    # than the real input height.
    itemsize = jnp.dtype(x_hwnc.dtype).itemsize
    padded_nc = _round_up(N, 8) * _round_up(C, 128) * itemsize
    bytes_per_pooled_row = s * W * padded_nc
    tHo = max(1, min(Ho, _POOL_BLOCK_BYTES // max(1, bytes_per_pooled_row)))
    tHo = min(tHo, max(1, pl.cdiv(Ho, 2)))
    tHo = max(1, min(tHo, H // s)) if H >= s else 1
    nb = pl.cdiv(Ho, tHo)
    # TODO(synk): add a W-axis tiling fallback for the (rare) case where a single
    #             pooled-row block exceeds the VMEM budget.

    kernel = functools.partial(_maxpool_kernel, stride=s, H=H, Ho=Ho)
    return pl.pallas_call(
        kernel,
        out_shape=jax.ShapeDtypeStruct((Ho, Wo, N, C), x_hwnc.dtype),
        grid=(nb,),
        in_specs=[
            pl.BlockSpec((s * tHo, W, N, C), lambda b: (b, 0, 0, 0)),
            # s-row halo just above the block (clamped for b == 0; masked in-kernel).
            pl.BlockSpec((s, W, N, C),
                         lambda b: (jnp.maximum(b * tHo - 1, 0), 0, 0, 0)),
        ],
        out_specs=pl.BlockSpec((tHo, Wo, N, C), lambda b: (b, 0, 0, 0)),
        compiler_params=pltpu.CompilerParams(
            dimension_semantics=("parallel",),
            vmem_limit_bytes=_VMEM_LIMIT_BYTES),
    )(x_hwnc, x_hwnc)


# --------------------------- 1x1 conv + BN kernels --------------------------


def _conv1x1_bn_rows_kernel(x_ref, w_ref, shift_ref, o_ref):
    """rows (tm, Cin) @ weight (Cin, tn) + shift (1, tn) -> (tm, tn)."""
    y = jnp.dot(x_ref[...], w_ref[...], preferred_element_type=jnp.float32)
    o_ref[...] = (y + shift_ref[...]).astype(o_ref.dtype)


def conv1x1_bn_rows(x_rows, w_co, shift_row, *, tm=512, tn_cap=256):
    """(M, Cin) @ (Cin, Cout) + shift, BN scale pre-folded into the weight.

    The weight stays VMEM-resident (constant block index) when small; otherwise the
    Cout axis is the OUTER grid axis so each weight slab is streamed exactly once.
    """
    M, Cin = x_rows.shape
    Cout = w_co.shape[1]
    tm = min(tm, M)
    resident = Cin * Cout * x_rows.dtype.itemsize <= _RESIDENT_W_BYTES
    tn = Cout if (resident or Cout <= tn_cap) else tn_cap
    return pl.pallas_call(
        _conv1x1_bn_rows_kernel,
        out_shape=jax.ShapeDtypeStruct((M, Cout), x_rows.dtype),
        grid=(pl.cdiv(Cout, tn), pl.cdiv(M, tm)),      # Cout outer, rows inner
        in_specs=[
            pl.BlockSpec((tm, Cin), lambda o, i: (i, 0)),
            pl.BlockSpec((Cin, tn), lambda o, i: (0, o)),
            pl.BlockSpec((1, tn), lambda o, i: (0, o)),
        ],
        out_specs=pl.BlockSpec((tm, tn), lambda o, i: (i, o)),
        compiler_params=pltpu.CompilerParams(
            dimension_semantics=("parallel", "parallel"),
            vmem_limit_bytes=_VMEM_LIMIT_BYTES),
    )(x_rows, w_co, shift_row)


def _conv1x1_bn_nchw_kernel(x_ref, w_ref, shift_ref, o_ref):
    """weight (tn, Cin) @ x (Cin, tL) + shift (tn, 1) -> (tn, tL), lane-dense output."""
    y = jnp.dot(w_ref[...], x_ref[...], preferred_element_type=jnp.float32)
    o_ref[...] = (y + shift_ref[...]).astype(o_ref.dtype)


def conv1x1_bn_nchw(x_ncl, w_oc, shift_col, *, tl=512, tn_cap=256):
    """1x1 conv + folded BN directly on (N, Cin, H*W) -> (N, Cout, H*W); no transposes."""
    N, Cin, L = x_ncl.shape
    Cout = w_oc.shape[0]
    tl = L if L <= tl else tl
    resident = Cin * Cout * x_ncl.dtype.itemsize <= _RESIDENT_W_BYTES
    tn = Cout if (resident or Cout <= tn_cap) else tn_cap
    return pl.pallas_call(
        _conv1x1_bn_nchw_kernel,
        out_shape=jax.ShapeDtypeStruct((N, Cout, L), x_ncl.dtype),
        grid=(N, pl.cdiv(Cout, tn), pl.cdiv(L, tl)),
        in_specs=[
            pl.BlockSpec((None, Cin, tl), lambda n, o, l: (n, 0, l)),
            pl.BlockSpec((tn, Cin), lambda n, o, l: (o, 0)),
            pl.BlockSpec((tn, 1), lambda n, o, l: (o, 0)),
        ],
        out_specs=pl.BlockSpec((None, tn, tl), lambda n, o, l: (n, o, l)),
        compiler_params=pltpu.CompilerParams(
            dimension_semantics=("parallel", "parallel", "parallel"),
            vmem_limit_bytes=_VMEM_LIMIT_BYTES),
    )(x_ncl, w_oc, shift_col)


# --------------------------------- module -----------------------------------


class BasicProxyPallas:
    """JAX/Pallas equivalent of BasicProxy.forward (inference semantics)."""

    def __init__(self, in_channels, out_channels, stride=1, key=None):
        self.in_channels = in_channels
        self.out_channels = out_channels
        self.stride = stride
        self.eps = 1e-5
        k1, k2, k3, k4, k5 = jax.random.split(key, 5)
        # kaiming_normal_ on a (Cout, Cin, 1, 1) weight: std = sqrt(2 / fan_in).
        std = float(np.sqrt(2.0 / in_channels))
        self.conv_w = jax.random.normal(k1, (out_channels, in_channels),
                                        dtype=jnp.float32) * std        # (Cout, Cin)
        self.bn_gamma = jax.random.uniform(k2, (out_channels,), minval=0.5, maxval=1.5)
        self.bn_beta = jax.random.normal(k3, (out_channels,)) * 0.1
        self.bn_mean = jax.random.normal(k4, (out_channels,)) * 0.1
        self.bn_var = jax.random.uniform(k5, (out_channels,), minval=0.5, maxval=1.5)
        # Fold eval-mode BN into the 1x1 conv.
        scale = self.bn_gamma / jnp.sqrt(self.bn_var + self.eps)              # (Cout,)
        self.w_oc = (self.conv_w * scale[:, None]).astype(jnp.float32)        # (Cout, Cin)
        self.w_co = jnp.transpose(self.w_oc)                                  # (Cin, Cout)
        shift = self.bn_beta - self.bn_mean * scale
        self.shift_row = shift.reshape(1, -1).astype(jnp.float32)             # (1, Cout)
        self.shift_col = shift.reshape(-1, 1).astype(jnp.float32)             # (Cout, 1)

    def __call__(self, x_nchw):
        N, Cin, H, W = x_nchw.shape
        Cout = self.out_channels
        if self.stride > 1:
            # (H, W, N, C): both pooled axes are untiled leading dims inside the kernel.
            x_hwnc = jnp.transpose(x_nchw, (2, 3, 0, 1))
            pooled = maxpool2d_hwnc(x_hwnc, self.stride)            # (Ho, Wo, N, Cin)
            Ho, Wo = pooled.shape[0], pooled.shape[1]
            rows = pooled.reshape(Ho * Wo * N, Cin)                 # contiguous -> free
            out = conv1x1_bn_rows(rows, self.w_co, self.shift_row)
            out = out.reshape(Ho, Wo, N, Cout)
            return jnp.transpose(out, (2, 3, 0, 1))                 # NCHW
        # stride == 1: 1x1 conv as (Cout,Cin)@(Cin,H*W) per image, no layout changes.
        x3 = x_nchw.reshape(N, Cin, H * W)                          # free reshape
        out = conv1x1_bn_nchw(x3, self.w_oc, self.shift_col)
        return out.reshape(N, Cout, H, W)                           # free reshape


# ------------------------------- reference ----------------------------------


def reference(x, proxy):
    s = proxy.stride
    if s > 1:
        pad = s // 2
        x = jax.lax.reduce_window(
            x, -jnp.inf, jax.lax.max,
            window_dimensions=(1, 1, s + 1, s + 1),
            window_strides=(1, 1, s, s),
            padding=((0, 0), (0, 0), (pad, pad), (pad, pad)))
    y = jnp.einsum('nchw,oc->nohw', x, proxy.conv_w)
    scale = proxy.bn_gamma / jnp.sqrt(proxy.bn_var + proxy.eps)
    shift = proxy.bn_beta - proxy.bn_mean * scale
    return y * scale[None, :, None, None] + shift[None, :, None, None]


if __name__ == "__main__":
    key = jax.random.PRNGKey(0)
    kx, kp = jax.random.split(key)
    x = jax.random.normal(kx, (2, 4, 16, 16), dtype=jnp.float32)

    # stride = 2 path (maxpool + conv1x1 + folded BN)
    proxy2 = BasicProxyPallas(in_channels=4, out_channels=8, stride=2, key=kp)
    out2 = jax.block_until_ready(proxy2(x))
    np.testing.assert_allclose(np.asarray(out2), np.asarray(reference(x, proxy2)),
                               rtol=1e-5, atol=1e-5)
    assert out2.shape == (2, 8, 8, 8)

    # stride = 1 path (conv1x1 + folded BN straight on NCHW)
    proxy1 = BasicProxyPallas(in_channels=4, out_channels=8, stride=1, key=kp)
    out1 = jax.block_until_ready(proxy1(x))
    np.testing.assert_allclose(np.asarray(out1), np.asarray(reference(x, proxy1)),
                               rtol=1e-5, atol=1e-5)
    assert out1.shape == (2, 8, 16, 16)

    # odd spatial size: exercises the in-kernel bottom/right pool-boundary fix-ups
    x_odd = jax.random.normal(kx, (2, 4, 15, 15), dtype=jnp.float32)
    out_odd = jax.block_until_ready(proxy2(x_odd))
    np.testing.assert_allclose(np.asarray(out_odd), np.asarray(reference(x_odd, proxy2)),
                               rtol=1e-5, atol=1e-5)

    # stride = 3: general kernel_size = stride+1 / padding = stride//2 path
    proxy3 = BasicProxyPallas(in_channels=4, out_channels=8, stride=3, key=kp)
    out3 = jax.block_until_ready(proxy3(x))
    np.testing.assert_allclose(np.asarray(out3), np.asarray(reference(x, proxy3)),
                               rtol=1e-5, atol=1e-5)

    print("KERNEL_OK")
</pallas_src>

<mosaic_0001>
module attributes {stable_mosaic.version = 11 : i64} {
  func.func @_maxpool_kernel(%arg0: i32, %arg1: memref<8x16x2x4xf32, #tpu.memory_space<vmem>>, %arg2: memref<2x16x2x4xf32, #tpu.memory_space<vmem>>, %arg3: memref<4x8x2x4xf32, #tpu.memory_space<vmem>>) attributes {dimension_semantics = [#tpu.dimension_semantics<parallel>], iteration_bounds = array<i64: 2>, scalar_prefetch = 0 : i64, scratch_operands = 0 : i64, tpu.core_type = #tpu.core_type<tc>, window_params = [{transform_indices = @transform_0, window_bounds = array<i64: 8, 16, 2, 4>}, {transform_indices = @transform_1, window_bounds = array<i64: 2, 16, 2, 4>}, {transform_indices = @transform_2, window_bounds = array<i64: 4, 8, 2, 4>}]} {
    %c0 = arith.constant 0 : index
    %c0_0 = arith.constant 0 : index
    %c0_1 = arith.constant 0 : index
    %c0_2 = arith.constant 0 : index
    %0 = vector.load %arg1[%c0, %c0_0, %c0_1, %c0_2] : memref<8x16x2x4xf32, #tpu.memory_space<vmem>>, vector<8x16x2x4xf32>
    %1 = vector.shape_cast %0 : vector<8x16x2x4xf32> to vector<4x2x16x2x4xf32>
    %cst = arith.constant dense<0xFF800000> : vector<4x16x2x4xf32>
    %2 = vector.multi_reduction <maximumf>, %1, %cst [1] : vector<4x2x16x2x4xf32> to vector<4x16x2x4xf32>
    %3 = vector.extract_strided_slice %1 {offsets = [0, 1, 0, 0, 0], sizes = [4, 1, 16, 2, 4], strides = [1, 1, 1, 1, 1]} : vector<4x2x16x2x4xf32> to vector<4x1x16x2x4xf32>
    %cst_3 = arith.constant dense<0xFF800000> : vector<4x16x2x4xf32>
    %4 = vector.multi_reduction <maximumf>, %3, %cst_3 [1] : vector<4x1x16x2x4xf32> to vector<4x16x2x4xf32>
    %c1 = arith.constant 1 : index
    %c0_4 = arith.constant 0 : index
    %c0_5 = arith.constant 0 : index
    %c0_6 = arith.constant 0 : index
    %5 = vector.load %arg2[%c1, %c0_4, %c0_5, %c0_6] : memref<2x16x2x4xf32, #tpu.memory_space<vmem>>, vector<1x16x2x4xf32>
    %cst_7 = arith.constant dense<0xFF800000> : vector<16x2x4xf32>
    %6 = vector.multi_reduction <maximumf>, %5, %cst_7 [0] : vector<1x16x2x4xf32> to vector<16x2x4xf32>
    %7 = vector.shape_cast %6 : vector<16x2x4xf32> to vector<1x16x2x4xf32>
    %c0_i32 = arith.constant 0 : i32
    %8 = arith.cmpi eq, %arg0, %c0_i32 : i32
    %cst_8 = arith.constant 0xFF800000 : f32
    %9 = vector.broadcast %cst_8 : f32 to vector<1x16x2x4xf32>
    %10 = arith.select %8, %9, %7 : vector<1x16x2x4xf32>
    %11 = vector.extract_strided_slice %4 {offsets = [0, 0, 0, 0], sizes = [3, 16, 2, 4], strides = [1, 1, 1, 1]} : vector<4x16x2x4xf32> to vector<3x16x2x4xf32>
    %12 = tpu.concatenate %10, %11 in 0 : vector<1x16x2x4xf32>, vector<3x16x2x4xf32> -> vector<4x16x2x4xf32>
    %13 = arith.maximumf %2, %12 : vector<4x16x2x4xf32>
    %14 = vector.shape_cast %13 : vector<4x16x2x4xf32> to vector<4x8x2x2x4xf32>
    %cst_9 = arith.constant dense<0xFF800000> : vector<4x8x2x4xf32>
    %15 = vector.multi_reduction <maximumf>, %14, %cst_9 [2] : vector<4x8x2x2x4xf32> to vector<4x8x2x4xf32>
    %16 = vector.extract_strided_slice %14 {offsets = [0, 0, 1, 0, 0], sizes = [4, 8, 1, 2, 4], strides = [1, 1, 1, 1, 1]} : vector<4x8x2x2x4xf32> to vector<4x8x1x2x4xf32>
    %cst_10 = arith.constant dense<0xFF800000> : vector<4x8x2x4xf32>
    %17 = vector.multi_reduction <maximumf>, %16, %cst_10 [2] : vector<4x8x1x2x4xf32> to vector<4x8x2x4xf32>
    %cst_11 = arith.constant 0xFF800000 : f32
    %18 = vector.broadcast %cst_11 : f32 to vector<4x1x2x4xf32>
    %19 = vector.extract_strided_slice %17 {offsets = [0, 0, 0, 0], sizes = [4, 7, 2, 4], strides = [1, 1, 1, 1]} : vector<4x8x2x4xf32> to vector<4x7x2x4xf32>
    %20 = tpu.concatenate %18, %19 in 1 : vector<4x1x2x4xf32>, vector<4x7x2x4xf32> -> vector<4x8x2x4xf32>
    %21 = arith.maximumf %15, %20 : vector<4x8x2x4xf32>
    %c0_12 = arith.constant 0 : index
    %c0_13 = arith.constant 0 : index
    %c0_14 = arith.constant 0 : index
    %c0_15 = arith.constant 0 : index
    %22 = vector.load %arg3[%c0_12, %c0_13, %c0_14, %c0_15] : memref<4x8x2x4xf32, #tpu.memory_space<vmem>>, vector<4x8x2x4xf32>
    tpu.vector_store %arg3[%c0_12, %c0_13, %c0_14, %c0_15], %21 {strides = array<i32>} : memref<4x8x2x4xf32, #tpu.memory_space<vmem>>, vector<4x8x2x4xf32>,
    return
  }
  func.func @transform_0(%arg0: i32) -> (i32, i32, i32, i32) {
    %c0_i32 = arith.constant 0 : i32
    %c0_i32_0 = arith.constant 0 : i32
    %c0_i32_1 = arith.constant 0 : i32
    %c0_i32_2 = arith.constant 0 : i32
    return %arg0, %c0_i32, %c0_i32_0, %c0_i32_1 : i32, i32, i32, i32
  }
  func.func @transform_1(%arg0: i32) -> (i32, i32, i32, i32) {
    %c4_i32 = arith.constant 4 : i32
    %0 = arith.muli %arg0, %c4_i32 : i32
    %c1_i32 = arith.constant 1 : i32
    %1 = arith.subi %0, %c1_i32 : i32
    %c0_i32 = arith.constant 0 : i32
    %2 = arith.maxsi %1, %c0_i32 : i32
    %c0_i32_0 = arith.constant 0 : i32
    %c0_i32_1 = arith.constant 0 : i32
    %c0_i32_2 = arith.constant 0 : i32
    %c0_i32_3 = arith.constant 0 : i32
    return %2, %c0_i32_0, %c0_i32_1, %c0_i32_2 : i32, i32, i32, i32
  }
  func.func @transform_2(%arg0: i32) -> (i32, i32, i32, i32) {
    %c0_i32 = arith.constant 0 : i32
    %c0_i32_0 = arith.constant 0 : i32
    %c0_i32_1 = arith.constant 0 : i32
    %c0_i32_2 = arith.constant 0 : i32
    return %arg0, %c0_i32, %c0_i32_0, %c0_i32_1 : i32, i32, i32, i32
  }
}

</mosaic_0001>

<bundles_post_ra>
// kernel: tpu_custom_call.1
= control target key start
LH: loop header
LB: loop body
LE: loop exit
PB: predicated region body
PF: predicated region fallthrough
CT: control target
= control target key end

     0   :  { %s927_s9 = smov 0   ;;  %s1591_s0 = inlined_call_operand.vmem [shape: f32[16,16,2,4], index: 0, kind: input, shape index: {}]   ;;  %s1592_s1 = inlined_call_operand.vmem [shape: f32[16,16,2,4], index: 1, kind: input, shape index: {}]   ;;  %s1593_s2 = inlined_call_operand.vmem [shape: f32[8,8,2,4], index: 2, kind: output, shape index: {}]  }
   0x1 LB: > { %s933_s10 = sadd.s32 4294967295, %s910_s9   ;;  %p861_p0 = scmp.ge.s32.totalorder %s910_s9, 1  ;;  %s910_s9 = sphi %s927_s9, %s12_s9  }
   0x2   : > { %p142_p1 = scmp.lt.s32.totalorder %s910_s9, 3 }
   0x4   : > { %p143_p2 = pnand %p861_p0, %p142_p1 }
   0x5   : > { %s862_s11 = sshll.u32 (!%p143_p2), %s933_s10, 3  ;;  %s865_s12 = sshll.u32 (!%p143_p2), %s933_s10, 2 }
   0x6   : > { %146 = sbr.rel (%p143_p2) target bundleno = 127 (0x7f), region = 28  ;;  %p177_p3 = scmp.lt.s32.totalorder (!%p143_p2), %s862_s11, 15 }
   0x7   : > { %s866_s13 = sadd.s32 (!%p143_p2), 4294967295, %s865_s12  ;;  %p199_p5 = scmp.lt.s32.totalorder (!%p143_p2), %s865_s12, 7 }
   0x8   : > { %p185_p4 = scmp.gt.s32.totalorder (!%p143_p2), %s866_s13, 0  ;;  %p543_p7 = scmp.eq.s32.totalorder (!%p143_p2), %s933_s10, 0 }
   0xb   : > { %s1597_s11 = smov (!%p177_p3, %s862_s11), 15  ;;  %s1599_s13 = smov (!%p185_p4, %s866_s13), 0  ;;  %vm333_vm0 = vcmask 25600  }
   0xc   : > { %s893_s14 = sshll.u32 %s1597_s11, 5  ;;  %s867_s18 = sshll.u32 %s1599_s13, 1 }
   0xd   : > { %s942_s17 = scalar_lea.vmem %s1591_s0, %s893_s14  ;;  %p188_p6 = scmp.lt.s32.totalorder %s867_s18, 15 }
   0xe   : > { %v205_v0 = vld [vmem:[%s942_s17] sm:$0x3]  ;;  %v206_v1 = vld [vmem:[%s942_s17 + $0x2] sm:$0x3]  ;;  %s1601_s12 = smov (!%p199_p5, %s865_s12), 7 }
   0xf   : > { %v950_v2 = vld [vmem:[%s942_s17 + $0x20] sm:$0x3]  ;;  %v953_v3 = vld [vmem:[%s942_s17 + $0x22] sm:$0x3]  ;;  %s1603_s18 = smov (!%p188_p6, %s867_s18), 15  ;;  %v334_v4 = vsel %vm333_vm0, %v205_v0, -inf }
  0x10   : > { %v335_v5 = vsel %vm333_vm0, %v950_v2, -inf  ;;  %v207_v6 = vld [vmem:[%s942_s17 + $0x4] sm:$0x3]  ;;  %v337_v7 = vsel %vm333_vm0, %v206_v1, -inf  ;;  %v338_v8 = vsel %vm333_vm0, %v953_v3, -inf  ;;  %s894_s19 = sshll.u32 %s1603_s18, 5 }
  0x11   : > { %v208_v9 = vld [vmem:[%s942_s17 + $0x6] sm:$0x3]  ;;  %v964_v10 = vld [vmem:[%s942_s17 + $0x24] sm:$0x3]  ;;  %v340_v12 = vsel %vm333_vm0, %v207_v6, -inf  ;;  %s976_s22 = scalar_lea.vmem %s1592_s1, %s894_s19  ;;  %v336_v20 = vmax.f32 %v334_v4, %v335_v5  ;;  %v339_v21 = vmax.f32 %v337_v7, %v338_v8  ;;  %s895_s24 = sshll.u32 %s1601_s12, 4 }
  0x12   : > { %v967_v11 = vld [vmem:[%s942_s17 + $0x26] sm:$0x3]  ;;  %v341_v13 = vsel %vm333_vm0, %v964_v10, -inf  ;;  %v343_v14 = vsel %vm333_vm0, %v208_v9, -inf  ;;  %v209_v16 = vld [vmem:[%s942_s17 + $0x8] sm:$0x3]  ;;  %s1032_s27 = scalar_lea.vmem %s1593_s2, %s895_s24 }
  0x13   : > { %v344_v15 = vsel %vm333_vm0, %v967_v11, -inf  ;;  %v210_v17 = vld [vmem:[%s942_s17 + $0xa] sm:$0x3]  ;;  %v873_v18 = vld [vmem:[%s976_s22 + $0x20] sm:$0x3]  ;;  %v342_v22 = vmax.f32 %v340_v12, %v341_v13  ;;  %v346_v29 = vsel %vm333_vm0, %v209_v16, -inf }
  0x14   : > { %v874_v19 = vld [vmem:[%s976_s22 + $0x22] sm:$0x3]  ;;  %s544_s23 = scalar_select %p543_p7, 1, 0  ;;  %v345_v23 = vmax.f32 %v343_v14, %v344_v15  ;;  %v875_v24 = vld [vmem:[%s976_s22 + $0x24] sm:$0x3] }
  0x15   : > { %v876_v25 = vld [vmem:[%s976_s22 + $0x26] sm:$0x3]  ;;  %v989_v26 = vld [vmem:[%s942_s17 + $0x28] sm:$0x3]  ;;  %v993_v28 = vld [vmem:[%s942_s17 + $0x2a] sm:$0x3] }
  0x16   : > { %v545_v27 = vstv %s544_s23  ;;  %v347_v30 = vsel %vm333_vm0, %v989_v26, -inf  ;;  %v349_v31 = vsel %vm333_vm0, %v210_v17, -inf  ;;  %v350_v34 = vsel %vm333_vm0, %v993_v28, -inf  ;;  %v877_v35 = vld [vmem:[%s976_s22 + $0x28] sm:$0x3] }
  0x17   : > { %vm999_vm1 = vcmp.eq.s32.totalorder %v545_v27, 1  ;;  %v348_v33 = vmax.f32 %v346_v29, %v347_v30  ;;  %v878_v36 = vld [vmem:[%s976_s22 + $0x2a] sm:$0x3]  ;;  %v211_v41 = vld [vmem:[%s942_s17 + $0xc] sm:$0x3]  ;;  %v351_v49 = vmax.f32 %v349_v31, %v350_v34 }
  0x18   : > { %v547_v37 = vsel %vm999_vm1, -inf, %v873_v18  ;;  %v548_v38 = vsel %vm999_vm1, -inf, %v874_v19  ;;  %v549_v39 = vsel %vm999_vm1, -inf, %v875_v24  ;;  %v550_v40 = vsel %vm999_vm1, -inf, %v876_v25  ;;  %v212_v46 = vld [vmem:[%s942_s17 + $0xe] sm:$0x3] }
  0x19   : > { %v563_v42 = vmax.f32 %v336_v20, %v547_v37  ;;  %v564_v43 = vmax.f32 %v339_v21, %v548_v38  ;;  %v565_v44 = vmax.f32 %v342_v22, %v549_v39  ;;  %v566_v45 = vmax.f32 %v345_v23, %v550_v40  ;;  %v1018_v47 = vld [vmem:[%s942_s17 + $0x2c] sm:$0x3]  ;;  %v1021_v48 = vld [vmem:[%s942_s17 + $0x2e] sm:$0x3]  ;;  %v213_v63 = vld [vmem:[%s942_s17 + $0x10] sm:$0x3] }
  0x1a   : > { %v551_v50 = vsel %vm999_vm1, -inf, %v877_v35  ;;  %v552_v51 = vsel %vm999_vm1, -inf, %v878_v36  ;;  %v352_v52 = vsel %vm333_vm0, %v211_v41, -inf  ;;  %v879_v53 = vld [vmem:[%s976_s22 + $0x2c] sm:$0x3]  ;;  %v353_v4 = vsel %vm333_vm0, %v1018_v47, -inf }
  0x1b   : > { %v627_v54 = vsel %vm333_vm0, %v563_v42, -inf  ;;  %v628_v55 = vsel %vm333_vm0, %v564_v43, -inf  ;;  %v630_v56 = vsel %vm333_vm0, %v565_v44, -inf  ;;  %v631_v57 = vsel %vm333_vm0, %v566_v45, -inf  ;;  %v880_v58 = vld [vmem:[%s976_s22 + $0x2e] sm:$0x3] }
  0x1c   : > { %v629_v59 = vmax.f32 %v627_v54, %v628_v55  ;;  %v632_v60 = vmax.f32 %v630_v56, %v631_v57  ;;  %v567_v61 = vmax.f32 %v348_v33, %v551_v50  ;;  %v568_v62 = vmax.f32 %v351_v49, %v552_v51  ;;  %v214_v0 = vld [vmem:[%s942_s17 + $0x12] sm:$0x3]  ;;  %v1042_v1 = vld [vmem:[%s942_s17 + $0x30] sm:$0x3]  ;;  %v215_v21 = vld [vmem:[%s942_s17 + $0x14] sm:$0x3] }
  0x1d   : > { %v355_v5 = vsel %vm333_vm0, %v212_v46, -inf  ;;  %v356_v6 = vsel %vm333_vm0, %v1021_v48, -inf  ;;  %v553_v7 = vsel %vm999_vm1, -inf, %v879_v53  ;;  %v1052_v8 = vld [vmem:[%s942_s17 + $0x32] sm:$0x3]  ;;  %v354_v14 = vmax.f32 %v352_v52, %v353_v4 }
  0x1e   : > { %751 = vst.msk [vmem:[%s1032_s27] sm:$0x3] %vm333_vm0, %v629_v59  ;;  %v723_v9 = vmax.f32 %v632_v60, %v564_v43  ;;  %v633_v12 = vsel %vm333_vm0, %v567_v61, -inf  ;;  %v634_v13 = vsel %vm333_vm0, %v568_v62, -inf  ;;  %v881_v15 = vld [vmem:[%s976_s22 + $0x30] sm:$0x3]  ;;  %v357_v17 = vmax.f32 %v355_v5, %v356_v6 }
  0x1f   : > { %v635_v16 = vmax.f32 %v633_v12, %v634_v13  ;;  %v554_v18 = vsel %vm999_vm1, -inf, %v880_v58  ;;  %v358_v19 = vsel %vm333_vm0, %v213_v63, -inf  ;;  %v882_v20 = vld [vmem:[%s976_s22 + $0x32] sm:$0x3]  ;;  %v569_v22 = vmax.f32 %v354_v14, %v553_v7  ;;  %v1072_v27 = vld [vmem:[%s942_s17 + $0x34] sm:$0x3] }
  0x20   : > { %752 = vst.msk [vmem:[%s1032_s27 + $0x2] sm:$0x3] %vm333_vm0, %v723_v9  ;;  %v359_v23 = vsel %vm333_vm0, %v1042_v1, -inf  ;;  %v361_v24 = vsel %vm333_vm0, %v214_v0, -inf  ;;  %v362_v25 = vsel %vm333_vm0, %v1052_v8, -inf  ;;  %v570_v30 = vmax.f32 %v357_v17, %v554_v18 }
  0x21   : > { %v724_v29 = vmax.f32 %v635_v16, %v566_v45  ;;  %v360_v31 = vmax.f32 %v358_v19, %v359_v23  ;;  %v363_v33 = vmax.f32 %v361_v24, %v362_v25  ;;  %v216_v34 = vld [vmem:[%s942_s17 + $0x16] sm:$0x3]  ;;  %v883_v36 = vld [vmem:[%s976_s22 + $0x34] sm:$0x3]  ;;  %v636_v37 = vsel %vm333_vm0, %v569_v22, -inf }
  0x22   : > { %v1076_v35 = vld [vmem:[%s942_s17 + $0x36] sm:$0x3]  ;;  %v555_v38 = vsel %vm999_vm1, -inf, %v881_v15  ;;  %v556_v39 = vsel %vm999_vm1, -inf, %v882_v20  ;;  %v364_v40 = vsel %vm333_vm0, %v215_v21, -inf  ;;  %v637_v42 = vsel %vm333_vm0, %v570_v30, -inf }
  0x23   : > { %v884_v41 = vld [vmem:[%s976_s22 + $0x36] sm:$0x3]  ;;  %753 = vst.msk [vmem:[%s1032_s27 + $0x4] sm:$0x3] %vm333_vm0, %v724_v29  ;;  %v571_v43 = vmax.f32 %v360_v31, %v555_v38  ;;  %v572_v44 = vmax.f32 %v363_v33, %v556_v39  ;;  %v365_v45 = vsel %vm333_vm0, %v1072_v27, -inf  ;;  %v638_v50 = vmax.f32 %v636_v37, %v637_v42 }
  0x24   : > { %v217_v46 = vld [vmem:[%s942_s17 + $0x18] sm:$0x3]  ;;  %v218_v49 = vld [vmem:[%s942_s17 + $0x1a] sm:$0x3]  ;;  %v366_v51 = vmax.f32 %v364_v40, %v365_v45  ;;  %v367_v52 = vsel %vm333_vm0, %v216_v34, -inf  ;;  %v368_v53 = vsel %vm333_vm0, %v1076_v35, -inf }
  0x25   : > { %v1097_v54 = vld [vmem:[%s942_s17 + $0x38] sm:$0x3]  ;;  %v1100_v55 = vld [vmem:[%s942_s17 + $0x3a] sm:$0x3]  ;;  %v639_v56 = vsel %vm333_vm0, %v571_v43, -inf  ;;  %v640_v57 = vsel %vm333_vm0, %v572_v44, -inf  ;;  %v369_v58 = vmax.f32 %v367_v52, %v368_v53  ;;  %v725_v61 = vmax.f32 %v638_v50, %v568_v62 }
  0x26   : > { %v557_v59 = vsel %vm999_vm1, -inf, %v883_v36  ;;  %v885_v60 = vld [vmem:[%s976_s22 + $0x38] sm:$0x3]  ;;  %v641_v63 = vmax.f32 %v639_v56, %v640_v57  ;;  %v558_v0 = vsel %vm999_vm1, -inf, %v884_v41  ;;  %v886_v5 = vld [vmem:[%s976_s22 + $0x3a] sm:$0x3] }
  0x27   : > { %v573_v4 = vmax.f32 %v366_v51, %v557_v59  ;;  %v219_v6 = vld [vmem:[%s942_s17 + $0x1c] sm:$0x3]  ;;  %v574_v7 = vmax.f32 %v369_v58, %v558_v0  ;;  %v370_v9 = vsel %vm333_vm0, %v217_v46, -inf  ;;  %v371_v12 = vsel %vm333_vm0, %v1097_v54, -inf  ;;  %754 = vst.msk [vmem:[%s1032_s27 + $0x6] sm:$0x3] %vm333_vm0, %v725_v61 }
  0x28   : > { %v373_v13 = vsel %vm333_vm0, %v218_v49, -inf  ;;  %v1116_v62 = vld [vmem:[%s942_s17 + $0x3c] sm:$0x3]  ;;  %v726_v14 = vmax.f32 %v641_v63, %v570_v30  ;;  %v372_v16 = vmax.f32 %v370_v9, %v371_v12  ;;  %v374_v17 = vsel %vm333_vm0, %v1100_v55, -inf  ;;  %v220_v18 = vld [vmem:[%s942_s17 + $0x1e] sm:$0x3] }
  0x29   : > { %v642_v15 = vsel %vm333_vm0, %v573_v4, -inf  ;;  %v1125_v19 = vld [vmem:[%s942_s17 + $0x3e] sm:$0x3]  ;;  %v643_v20 = vsel %vm333_vm0, %v574_v7, -inf  ;;  %v375_v21 = vmax.f32 %v373_v13, %v374_v17  ;;  %v559_v22 = vsel %vm999_vm1, -inf, %v885_v60 }
  0x2a   : > { %v560_v23 = vsel %vm999_vm1, -inf, %v886_v5  ;;  %v887_v24 = vld [vmem:[%s976_s22 + $0x3c] sm:$0x3]  ;;  %755 = vst.msk [vmem:[%s1032_s27 + $0x8] sm:$0x3] %vm333_vm0, %v726_v14  ;;  %v644_v25 = vmax.f32 %v642_v15, %v643_v20  ;;  %v575_v29 = vmax.f32 %v372_v16, %v559_v22  ;;  %v376_v30 = vsel %vm333_vm0, %v219_v6, -inf }
  0x2b   : > { %v377_v31 = vsel %vm333_vm0, %v1116_v62, -inf  ;;  %v888_v33 = vld [vmem:[%s976_s22 + $0x3e] sm:$0x3]  ;;  %v237_v34 = vld [vmem:[%s942_s17 + $0x40] sm:$0x3]  ;;  %v576_v36 = vmax.f32 %v375_v21, %v560_v23  ;;  %v379_v38 = vsel %vm333_vm0, %v220_v18, -inf }
  0x2c   : > { %v378_v37 = vmax.f32 %v376_v30, %v377_v31  ;;  %v380_v39 = vsel %vm333_vm0, %v1125_v19, -inf  ;;  %v238_v40 = vld [vmem:[%s942_s17 + $0x42] sm:$0x3]  ;;  %v1145_v41 = vld [vmem:[%s942_s17 + $0x60] sm:$0x3]  ;;  %v727_v42 = vmax.f32 %v644_v25, %v572_v44  ;;  %v645_v43 = vsel %vm333_vm0, %v575_v29, -inf }
  0x2d   : > { %v381_v45 = vmax.f32 %v379_v38, %v380_v39  ;;  %v561_v46 = vsel %vm999_vm1, -inf, %v887_v24  ;;  %v1151_v49 = vld [vmem:[%s942_s17 + $0x62] sm:$0x3]  ;;  %v239_v50 = vld [vmem:[%s942_s17 + $0x44] sm:$0x3]  ;;  %v646_v51 = vsel %vm333_vm0, %v576_v36, -inf }
  0x2e   : > { %v562_v52 = vsel %vm999_vm1, -inf, %v888_v33  ;;  %v577_v53 = vmax.f32 %v378_v37, %v561_v46  ;;  %v382_v44 = vsel %vm333_vm0, %v237_v34, -inf  ;;  %v1159_v56 = vld [vmem:[%s942_s17 + $0x64] sm:$0x3]  ;;  %756 = vst.msk [vmem:[%s1032_s27 + $0xa] sm:$0x3] %vm333_vm0, %v727_v42  ;;  %v647_v57 = vmax.f32 %v645_v43, %v646_v51 }
  0x2f   : > { %v578_v58 = vmax.f32 %v381_v45, %v562_v52  ;;  %v383_v59 = vsel %vm333_vm0, %v1145_v41, -inf  ;;  %v385_v60 = vsel %vm333_vm0, %v238_v40, -inf  ;;  %v240_v61 = vld [vmem:[%s942_s17 + $0x46] sm:$0x3]  ;;  %v386_v4 = vsel %vm333_vm0, %v1151_v49, -inf }
  0x30   : > { %v1168_v32 = vld [vmem:[%s942_s17 + $0x66] sm:$0x3]  ;;  %v648_v63 = vsel %vm333_vm0, %v577_v53, -inf  ;;  %v384_v0 = vmax.f32 %v382_v44, %v383_v59  ;;  %v388_v5 = vsel %vm333_vm0, %v239_v50, -inf  ;;  %v241_v6 = vld [vmem:[%s942_s17 + $0x48] sm:$0x3]  ;;  %v728_v9 = vmax.f32 %v647_v57, %v574_v7 }
  0x31   : > { %v649_v12 = vsel %vm333_vm0, %v578_v58, -inf  ;;  %v387_v13 = vmax.f32 %v385_v60, %v386_v4  ;;  %v389_v14 = vsel %vm333_vm0, %v1159_v56, -inf  ;;  %v1179_v15 = vld [vmem:[%s942_s17 + $0x68] sm:$0x3]  ;;  %v391_v20 = vsel %vm333_vm0, %v240_v61, -inf }
  0x32   : > { %v650_v16 = vmax.f32 %v648_v63, %v649_v12  ;;  %v579_v17 = vmax.f32 %v384_v0, %v950_v2  ;;  %v390_v18 = vmax.f32 %v388_v5, %v389_v14  ;;  %v242_v21 = vld [vmem:[%s942_s17 + $0x4a] sm:$0x3]  ;;  %757 = vst.msk [vmem:[%s1032_s27 + $0xc] sm:$0x3] %vm333_vm0, %v728_v9  ;;  %v392_v23 = vsel %vm333_vm0, %v1168_v32, -inf }
  0x33   : > { %v1185_v22 = vld [vmem:[%s942_s17 + $0x6a] sm:$0x3]  ;;  %v580_v7 = vmax.f32 %v387_v13, %v953_v3  ;;  %v394_v24 = vsel %vm333_vm0, %v241_v6, -inf  ;;  %v395_v2 = vsel %vm333_vm0, %v1179_v15, -inf  ;;  %v243_v25 = vld [vmem:[%s942_s17 + $0x4c] sm:$0x3]  ;;  %v393_v31 = vmax.f32 %v391_v20, %v392_v23 }
  0x34   : > { %v729_v29 = vmax.f32 %v650_v16, %v576_v36  ;;  %v651_v30 = vsel %vm333_vm0, %v579_v17, -inf  ;;  %v581_v33 = vmax.f32 %v390_v18, %v964_v10  ;;  %v244_v34 = vld [vmem:[%s942_s17 + $0x4e] sm:$0x3]  ;;  %v1200_v3 = vld [vmem:[%s942_s17 + $0x6c] sm:$0x3]  ;;  %v396_v38 = vmax.f32 %v394_v24, %v395_v2 }
  0x35   : > { %v652_v37 = vsel %vm333_vm0, %v580_v7, -inf  ;;  %v397_v39 = vsel %vm333_vm0, %v242_v21, -inf  ;;  %v398_v36 = vsel %vm333_vm0, %v1185_v22, -inf  ;;  %v1207_v40 = vld [vmem:[%s942_s17 + $0x6e] sm:$0x3]  ;;  %v582_v10 = vmax.f32 %v393_v31, %v967_v11 }
  0x36   : > { %758 = vst.msk [vmem:[%s1032_s27 + $0xe] sm:$0x3] %vm333_vm0, %v729_v29  ;;  %v653_v42 = vmax.f32 %v651_v30, %v652_v37  ;;  %v654_v43 = vsel %vm333_vm0, %v581_v33, -inf  ;;  %v399_v45 = vmax.f32 %v397_v39, %v398_v36  ;;  %v245_v46 = vld [vmem:[%s942_s17 + $0x50] sm:$0x3]  ;;  %v583_v51 = vmax.f32 %v396_v38, %v989_v26 }
  0x37   : > { %v246_v50 = vld [vmem:[%s942_s17 + $0x52] sm:$0x3]  ;;  %v400_v52 = vsel %vm333_vm0, %v243_v25, -inf  ;;  %v401_v53 = vsel %vm333_vm0, %v1200_v3, -inf  ;;  %v403_v44 = vsel %vm333_vm0, %v244_v34, -inf  ;;  %v655_v11 = vsel %vm333_vm0, %v582_v10, -inf }
  0x38   : > { %v1221_v57 = vld [vmem:[%s942_s17 + $0x70] sm:$0x3]  ;;  %759 = vst.msk [vmem:[%s1032_s27 + $0x10] sm:$0x3] %vm333_vm0, %v653_v42  ;;  %v584_v58 = vmax.f32 %v399_v45, %v993_v28  ;;  %v402_v59 = vmax.f32 %v400_v52, %v401_v53  ;;  %v404_v26 = vsel %vm333_vm0, %v1207_v40, -inf  ;;  %v656_v61 = vmax.f32 %v654_v43, %v655_v11 }
  0x39   : > { %v1230_v60 = vld [vmem:[%s942_s17 + $0x72] sm:$0x3]  ;;  %v657_v63 = vsel %vm333_vm0, %v583_v51, -inf  ;;  %v405_v0 = vmax.f32 %v403_v44, %v404_v26  ;;  %v406_v4 = vsel %vm333_vm0, %v245_v46, -inf  ;;  %v247_v5 = vld [vmem:[%s942_s17 + $0x54] sm:$0x3] }
  0x3a   : > { %v1236_v6 = vld [vmem:[%s942_s17 + $0x74] sm:$0x3]  ;;  %v658_v28 = vsel %vm333_vm0, %v584_v58, -inf  ;;  %v585_v9 = vmax.f32 %v402_v59, %v1018_v47  ;;  %v407_v12 = vsel %vm333_vm0, %v1221_v57, -inf  ;;  %v409_v13 = vsel %vm333_vm0, %v246_v50, -inf }
  0x3b   : > { %v730_v14 = vmax.f32 %v656_v61, %v580_v7  ;;  %v659_v16 = vmax.f32 %v657_v63, %v658_v28  ;;  %v586_v17 = vmax.f32 %v405_v0, %v1021_v48  ;;  %v408_v18 = vmax.f32 %v406_v4, %v407_v12  ;;  %v248_v20 = vld [vmem:[%s942_s17 + $0x56] sm:$0x3]  ;;  %v249_v2 = vld [vmem:[%s942_s17 + $0x58] sm:$0x3]  ;;  %v250_v31 = vld [vmem:[%s942_s17 + $0x5a] sm:$0x3] }
  0x3c   : > { %v1246_v21 = vld [vmem:[%s942_s17 + $0x76] sm:$0x3]  ;;  %v660_v23 = vsel %vm333_vm0, %v585_v9, -inf  ;;  %v410_v47 = vsel %vm333_vm0, %v1230_v60, -inf  ;;  %v412_v24 = vsel %vm333_vm0, %v247_v5, -inf  ;;  %v413_v7 = vsel %vm333_vm0, %v1236_v6, -inf }
  0x3d   : > { %760 = vst.msk [vmem:[%s1032_s27 + $0x12] sm:$0x3] %vm333_vm0, %v730_v14  ;;  %v731_v48 = vmax.f32 %v659_v16, %v582_v10  ;;  %v661_v25 = vsel %vm333_vm0, %v586_v17, -inf  ;;  %v411_v29 = vmax.f32 %v409_v13, %v410_v47  ;;  %v587_v30 = vmax.f32 %v408_v18, %v1042_v1  ;;  %v1261_v33 = vld [vmem:[%s942_s17 + $0x78] sm:$0x3] }
  0x3e   : > { %v662_v34 = vmax.f32 %v660_v23, %v661_v25  ;;  %v414_v37 = vmax.f32 %v412_v24, %v413_v7  ;;  %v415_v38 = vsel %vm333_vm0, %v248_v20, -inf  ;;  %v416_v39 = vsel %vm333_vm0, %v1246_v21, -inf  ;;  %v1267_v36 = vld [vmem:[%s942_s17 + $0x7a] sm:$0x3]  ;;  %v251_v45 = vld [vmem:[%s942_s17 + $0x5c] sm:$0x3] }
  0x3f   : > { %761 = vst.msk [vmem:[%s1032_s27 + $0x14] sm:$0x3] %vm333_vm0, %v731_v48  ;;  %v588_v42 = vmax.f32 %v411_v29, %v1052_v8  ;;  %v663_v1 = vsel %vm333_vm0, %v587_v30, -inf  ;;  %v417_v10 = vmax.f32 %v415_v38, %v416_v39  ;;  %v418_v43 = vsel %vm333_vm0, %v249_v2, -inf  ;;  %v252_v53 = vld [vmem:[%s942_s17 + $0x5e] sm:$0x3] }
  0x40   : > { %v732_v46 = vmax.f32 %v662_v34, %v584_v58  ;;  %v589_v50 = vmax.f32 %v414_v37, %v1072_v27  ;;  %v419_v51 = vsel %vm333_vm0, %v1261_v33, -inf  ;;  %v421_v52 = vsel %vm333_vm0, %v250_v31, -inf  ;;  %v1281_v44 = vld [vmem:[%s942_s17 + $0x7c] sm:$0x3]  ;;  %v1288_v26 = vld [vmem:[%s942_s17 + $0x7e] sm:$0x3] }
  0x41   : > { %v664_v8 = vsel %vm333_vm0, %v588_v42, -inf  ;;  %v590_v11 = vmax.f32 %v417_v10, %v1076_v35  ;;  %v420_v59 = vmax.f32 %v418_v43, %v419_v51  ;;  %v422_v58 = vsel %vm333_vm0, %v1267_v36, -inf  ;;  %v269_v4 = vld [vmem:[%s942_s17 + $0x80] sm:$0x3]  ;;  %v270_v20 = vld [vmem:[%s942_s17 + $0x82] sm:$0x3] }
  0x42   : > { %762 = vst.msk [vmem:[%s1032_s27 + $0x16] sm:$0x3] %vm333_vm0, %v732_v46  ;;  %v665_v27 = vmax.f32 %v663_v1, %v664_v8  ;;  %v666_v61 = vsel %vm333_vm0, %v589_v50, -inf  ;;  %v423_v63 = vmax.f32 %v421_v52, %v422_v58  ;;  %v424_v0 = vsel %vm333_vm0, %v251_v45, -inf  ;;  %v1296_v5 = vld [vmem:[%s942_s17 + $0xa0] sm:$0x3] }
  0x43   : > { %v667_v35 = vsel %vm333_vm0, %v590_v11, -inf  ;;  %v591_v28 = vmax.f32 %v420_v59, %v1097_v54  ;;  %v425_v9 = vsel %vm333_vm0, %v1281_v44, -inf  ;;  %v427_v12 = vsel %vm333_vm0, %v252_v53, -inf  ;;  %v1306_v23 = vld [vmem:[%s942_s17 + $0xa2] sm:$0x3] }
  0x44   : > { %v733_v13 = vmax.f32 %v665_v27, %v586_v17  ;;  %v668_v14 = vmax.f32 %v666_v61, %v667_v35  ;;  %v592_v16 = vmax.f32 %v423_v63, %v1100_v55  ;;  %v426_v18 = vmax.f32 %v424_v0, %v425_v9  ;;  %v271_v7 = vld [vmem:[%s942_s17 + $0x84] sm:$0x3]  ;;  %v272_v29 = vld [vmem:[%s942_s17 + $0x86] sm:$0x3]  ;;  %v273_v43 = vld [vmem:[%s942_s17 + $0x88] sm:$0x3] }
  0x45   : > { %v669_v47 = vsel %vm333_vm0, %v591_v28, -inf  ;;  %v428_v54 = vsel %vm333_vm0, %v1288_v26, -inf  ;;  %v430_v24 = vsel %vm333_vm0, %v269_v4, -inf  ;;  %v431_v17 = vsel %vm333_vm0, %v1296_v5, -inf  ;;  %v1321_v30 = vld [vmem:[%s942_s17 + $0xa4] sm:$0x3] }
  0x46   : > { %763 = vst.msk [vmem:[%s1032_s27 + $0x18] sm:$0x3] %vm333_vm0, %v733_v13  ;;  %v734_v55 = vmax.f32 %v668_v14, %v588_v42  ;;  %v670_v2 = vsel %vm333_vm0, %v592_v16, -inf  ;;  %v429_v48 = vmax.f32 %v427_v12, %v428_v54  ;;  %v593_v25 = vmax.f32 %v426_v18, %v1116_v62  ;;  %v1327_v39 = vld [vmem:[%s942_s17 + $0xa6] sm:$0x3] }
  0x47   : > { %v671_v31 = vmax.f32 %v669_v47, %v670_v2  ;;  %v432_v34 = vmax.f32 %v430_v24, %v431_v17  ;;  %v433_v37 = vsel %vm333_vm0, %v270_v20, -inf  ;;  %v434_v38 = vsel %vm333_vm0, %v1306_v23, -inf  ;;  %v274_v52 = vld [vmem:[%s942_s17 + $0x8a] sm:$0x3]  ;;  %v1341_v53 = vld [vmem:[%s942_s17 + $0xa8] sm:$0x3] }
  0x48   : > { %764 = vst.msk [vmem:[%s1032_s27 + $0x1a] sm:$0x3] %vm333_vm0, %v734_v55  ;;  %v594_v42 = vmax.f32 %v429_v48, %v1125_v19  ;;  %v672_v62 = vsel %vm333_vm0, %v593_v25, -inf  ;;  %v435_v1 = vmax.f32 %v433_v37, %v434_v38  ;;  %v436_v10 = vsel %vm333_vm0, %v271_v7, -inf  ;;  %v1348_v58 = vld [vmem:[%s942_s17 + $0xaa] sm:$0x3] }
  0x49   : > { %v735_v45 = vmax.f32 %v671_v31, %v590_v11  ;;  %v595_v46 = vmax.f32 %v432_v34, %v1145_v41  ;;  %v437_v50 = vsel %vm333_vm0, %v1321_v30, -inf  ;;  %v439_v51 = vsel %vm333_vm0, %v272_v29, -inf  ;;  %v275_v0 = vld [vmem:[%s942_s17 + $0x8c] sm:$0x3]  ;;  %v276_v20 = vld [vmem:[%s942_s17 + $0x8e] sm:$0x3] }
  0x4a   : > { %v673_v19 = vsel %vm333_vm0, %v594_v42, -inf  ;;  %v596_v8 = vmax.f32 %v435_v1, %v1151_v49  ;;  %v438_v59 = vmax.f32 %v436_v10, %v437_v50  ;;  %v440_v11 = vsel %vm333_vm0, %v1327_v39, -inf  ;;  %v1356_v4 = vld [vmem:[%s942_s17 + $0xac] sm:$0x3]  ;;  %v1366_v47 = vld [vmem:[%s942_s17 + $0xae] sm:$0x3] }
  0x4b   : > { %765 = vst.msk [vmem:[%s1032_s27 + $0x1c] sm:$0x3] %vm333_vm0, %v735_v45  ;;  %v674_v41 = vmax.f32 %v672_v62, %v673_v19  ;;  %v675_v27 = vsel %vm333_vm0, %v595_v46, -inf  ;;  %v441_v61 = vmax.f32 %v439_v51, %v440_v11  ;;  %v442_v63 = vsel %vm333_vm0, %v273_v43, -inf  ;;  %v277_v54 = vld [vmem:[%s942_s17 + $0x90] sm:$0x3] }
  0x4c   : > { %v676_v49 = vsel %vm333_vm0, %v596_v8, -inf  ;;  %v597_v35 = vmax.f32 %v438_v59, %v1159_v56  ;;  %v443_v28 = vsel %vm333_vm0, %v1341_v53, -inf  ;;  %v445_v9 = vsel %vm333_vm0, %v274_v52, -inf  ;;  %v278_v7 = vld [vmem:[%s942_s17 + $0x92] sm:$0x3] }
  0x4d   : > { %v736_v12 = vmax.f32 %v674_v41, %v592_v16  ;;  %v677_v13 = vmax.f32 %v675_v27, %v676_v49  ;;  %v598_v14 = vmax.f32 %v441_v61, %v1168_v32  ;;  %v444_v18 = vmax.f32 %v442_v63, %v443_v28  ;;  %v1383_v25 = vld [vmem:[%s942_s17 + $0xb0] sm:$0x3]  ;;  %v1386_v29 = vld [vmem:[%s942_s17 + $0xb2] sm:$0x3]  ;;  %v279_v10 = vld [vmem:[%s942_s17 + $0x94] sm:$0x3] }
  0x4e   : > { %v678_v24 = vsel %vm333_vm0, %v597_v35, -inf  ;;  %v446_v56 = vsel %vm333_vm0, %v1348_v58, -inf  ;;  %v448_v17 = vsel %vm333_vm0, %v275_v0, -inf  ;;  %v449_v16 = vsel %vm333_vm0, %v1356_v4, -inf  ;;  %v1397_v43 = vld [vmem:[%s942_s17 + $0xb4] sm:$0x3] }
  0x4f   : > { %766 = vst.msk [vmem:[%s1032_s27 + $0x1e] sm:$0x3] %vm333_vm0, %v736_v12  ;;  %767 = vst.msk [vmem:[%s1032_s27 + $0x20] sm:$0x3] %vm333_vm0, %v677_v13  ;;  %v679_v32 = vsel %vm333_vm0, %v598_v14, -inf  ;;  %v447_v55 = vmax.f32 %v445_v9, %v446_v56  ;;  %v599_v2 = vmax.f32 %v444_v18, %v1179_v15  ;;  %v450_v48 = vmax.f32 %v448_v17, %v449_v16 }
  0x50   : > { %v680_v31 = vmax.f32 %v678_v24, %v679_v32  ;;  %v451_v34 = vsel %vm333_vm0, %v276_v20, -inf  ;;  %v452_v37 = vsel %vm333_vm0, %v1366_v47, -inf  ;;  %v454_v38 = vsel %vm333_vm0, %v277_v54, -inf  ;;  %v1409_v11 = vld [vmem:[%s942_s17 + $0xb6] sm:$0x3] }
  0x51   : > { %v600_v42 = vmax.f32 %v447_v55, %v1185_v22  ;;  %v681_v15 = vsel %vm333_vm0, %v599_v2, -inf  ;;  %v453_v62 = vmax.f32 %v451_v34, %v452_v37  ;;  %v601_v1 = vmax.f32 %v450_v48, %v1200_v3  ;;  %v280_v22 = vld [vmem:[%s942_s17 + $0x96] sm:$0x3]  ;;  %v281_v63 = vld [vmem:[%s942_s17 + $0x98] sm:$0x3] }
  0x52   : > { %v737_v45 = vmax.f32 %v680_v31, %v596_v8  ;;  %v455_v46 = vsel %vm333_vm0, %v1383_v25, -inf  ;;  %v457_v50 = vsel %vm333_vm0, %v278_v7, -inf  ;;  %v458_v51 = vsel %vm333_vm0, %v1386_v29, -inf  ;;  %v282_v28 = vld [vmem:[%s942_s17 + $0x9a] sm:$0x3] }
  0x53   : > { %v682_v52 = vsel %vm333_vm0, %v600_v42, -inf  ;;  %v602_v3 = vmax.f32 %v453_v62, %v1207_v40  ;;  %v684_v19 = vsel %vm333_vm0, %v601_v1, -inf  ;;  %v456_v59 = vmax.f32 %v454_v38, %v455_v46  ;;  %v1422_v9 = vld [vmem:[%s942_s17 + $0xb8] sm:$0x3]  ;;  %v1428_v54 = vld [vmem:[%s942_s17 + $0xba] sm:$0x3] }
  0x54   : > { %768 = vst.msk [vmem:[%s1032_s27 + $0x22] sm:$0x3] %vm333_vm0, %v737_v45  ;;  %v683_v8 = vmax.f32 %v681_v15, %v682_v52  ;;  %v459_v41 = vmax.f32 %v457_v50, %v458_v51  ;;  %v460_v27 = vsel %vm333_vm0, %v279_v10, -inf  ;;  %v461_v61 = vsel %vm333_vm0, %v1397_v43, -inf  ;;  %v283_v24 = vld [vmem:[%s942_s17 + $0x9c] sm:$0x3] }
  0x55   : > { %v685_v0 = vsel %vm333_vm0, %v602_v3, -inf  ;;  %v603_v40 = vmax.f32 %v456_v59, %v1221_v57  ;;  %v462_v49 = vmax.f32 %v460_v27, %v461_v61  ;;  %v463_v35 = vsel %vm333_vm0, %v280_v22, -inf  ;;  %v1436_v7 = vld [vmem:[%s942_s17 + $0xbc] sm:$0x3]  ;;  %v1447_v37 = vld [vmem:[%s942_s17 + $0xbe] sm:$0x3] }
  0x56   : > { %v738_v12 = vmax.f32 %v683_v8, %v598_v14  ;;  %v686_v13 = vmax.f32 %v684_v19, %v685_v0  ;;  %v604_v18 = vmax.f32 %v459_v41, %v1230_v60  ;;  %v464_v20 = vsel %vm333_vm0, %v1409_v11, -inf  ;;  %v284_v14 = vld [vmem:[%s942_s17 + $0x9e] sm:$0x3]  ;;  %v301_v38 = vld [vmem:[%s942_s17 + $0xc0] sm:$0x3] }
  0x57   : > { %v687_v57 = vsel %vm333_vm0, %v603_v40, -inf  ;;  %v465_v56 = vmax.f32 %v463_v35, %v464_v20  ;;  %v605_v17 = vmax.f32 %v462_v49, %v1236_v6  ;;  %v466_v16 = vsel %vm333_vm0, %v281_v63, -inf  ;;  %v317_v1 = vld [vmem:[%s942_s17 + $0xe0] sm:$0x3]  ;;  %v302_v51 = vld [vmem:[%s942_s17 + $0xc2] sm:$0x3] }
  0x58   : > { %769 = vst.msk [vmem:[%s1032_s27 + $0x24] sm:$0x3] %vm333_vm0, %v738_v12  ;;  %v739_v60 = vmax.f32 %v686_v13, %v600_v42  ;;  %v688_v32 = vsel %vm333_vm0, %v604_v18, -inf  ;;  %v467_v55 = vsel %vm333_vm0, %v1422_v9, -inf  ;;  %v469_v2 = vsel %vm333_vm0, %v282_v28, -inf }
  0x59   : > { %v689_v48 = vmax.f32 %v687_v57, %v688_v32  ;;  %v606_v6 = vmax.f32 %v465_v56, %v1246_v21  ;;  %v690_v31 = vsel %vm333_vm0, %v605_v17, -inf  ;;  %v468_v34 = vmax.f32 %v466_v16, %v467_v55  ;;  %v318_v59 = vld [vmem:[%s942_s17 + $0xe2] sm:$0x3]  ;;  %v303_v41 = vld [vmem:[%s942_s17 + $0xc4] sm:$0x3] }
  0x5a   : > { %770 = vst.msk [vmem:[%s1032_s27 + $0x26] sm:$0x3] %vm333_vm0, %v739_v60  ;;  %v470_v42 = vsel %vm333_vm0, %v1428_v54, -inf  ;;  %v472_v15 = vsel %vm333_vm0, %v283_v24, -inf  ;;  %v473_v62 = vsel %vm333_vm0, %v1436_v7, -inf  ;;  %v475_v21 = vsel %vm333_vm0, %v284_v14, -inf }
  0x5b   : > { %v740_v10 = vmax.f32 %v689_v48, %v602_v3  ;;  %v691_v45 = vsel %vm333_vm0, %v606_v6, -inf  ;;  %v471_v46 = vmax.f32 %v469_v2, %v470_v42  ;;  %v607_v50 = vmax.f32 %v468_v34, %v1261_v33  ;;  %v304_v63 = vld [vmem:[%s942_s17 + $0xc6] sm:$0x3]  ;;  %v319_v28 = vld [vmem:[%s942_s17 + $0xe4] sm:$0x3] }
  0x5c   : > { %v692_v22 = vmax.f32 %v690_v31, %v691_v45  ;;  %v474_v52 = vmax.f32 %v472_v15, %v473_v62  ;;  %v476_v19 = vsel %vm333_vm0, %v1447_v37, -inf  ;;  %v478_v8 = vsel %vm333_vm0, %v301_v38, -inf  ;;  %v320_v12 = vld [vmem:[%s942_s17 + $0xe6] sm:$0x3]  ;;  %v305_v17 = vld [vmem:[%s942_s17 + $0xc8] sm:$0x3] }
  0x5d   : > { %771 = vst.msk [vmem:[%s1032_s27 + $0x28] sm:$0x3] %vm333_vm0, %v740_v10  ;;  %v608_v3 = vmax.f32 %v471_v46, %v1267_v36  ;;  %v693_v27 = vsel %vm333_vm0, %v607_v50, -inf  ;;  %v477_v33 = vmax.f32 %v475_v21, %v476_v19  ;;  %v479_v61 = vsel %vm333_vm0, %v317_v1, -inf  ;;  %v321_v16 = vld [vmem:[%s942_s17 + $0xe8] sm:$0x3] }
  0x5e   : > { %v741_v0 = vmax.f32 %v692_v22, %v604_v18  ;;  %v609_v40 = vmax.f32 %v474_v52, %v1281_v44  ;;  %v480_v49 = vmax.f32 %v478_v8, %v479_v61  ;;  %v481_v35 = vsel %vm333_vm0, %v302_v51, -inf  ;;  %v306_v55 = vld [vmem:[%s942_s17 + $0xca] sm:$0x3]  ;;  %v307_v21 = vld [vmem:[%s942_s17 + $0xcc] sm:$0x3] }
  0x5f   : > { %v694_v13 = vsel %vm333_vm0, %v608_v3, -inf  ;;  %v610_v36 = vmax.f32 %v477_v33, %v1288_v26  ;;  %v482_v20 = vsel %vm333_vm0, %v318_v59, -inf  ;;  %v484_v24 = vsel %vm333_vm0, %v303_v41, -inf  ;;  %v322_v34 = vld [vmem:[%s942_s17 + $0xea] sm:$0x3] }
  0x60   : > { %772 = vst.msk [vmem:[%s1032_s27 + $0x2a] sm:$0x3] %vm333_vm0, %v741_v0  ;;  %v695_v18 = vmax.f32 %v693_v27, %v694_v13  ;;  %v696_v44 = vsel %vm333_vm0, %v609_v40, -inf  ;;  %v483_v57 = vmax.f32 %v481_v35, %v482_v20  ;;  %v611_v56 = vmax.f32 %v480_v49, %v1296_v5  ;;  %v323_v1 = vld [vmem:[%s942_s17 + $0xec] sm:$0x3] }
  0x61   : > { %v697_v14 = vsel %vm333_vm0, %v610_v36, -inf  ;;  %v485_v26 = vsel %vm333_vm0, %v319_v28, -inf  ;;  %v487_v60 = vsel %vm333_vm0, %v304_v63, -inf  ;;  %v488_v32 = vsel %vm333_vm0, %v320_v12, -inf  ;;  %v308_v46 = vld [vmem:[%s942_s17 + $0xce] sm:$0x3] }
  0x62   : > { %v742_v2 = vmax.f32 %v695_v18, %v606_v6  ;;  %v698_v48 = vmax.f32 %v696_v44, %v697_v14  ;;  %v612_v31 = vmax.f32 %v483_v57, %v1306_v23  ;;  %v699_v5 = vsel %vm333_vm0, %v611_v56, -inf  ;;  %v324_v19 = vld [vmem:[%s942_s17 + $0xee] sm:$0x3]  ;;  %v309_v27 = vld [vmem:[%s942_s17 + $0xd0] sm:$0x3] }
  0x63   : > { %v486_v38 = vmax.f32 %v484_v24, %v485_v26  ;;  %v489_v42 = vmax.f32 %v487_v60, %v488_v32  ;;  %v490_v15 = vsel %vm333_vm0, %v305_v17, -inf  ;;  %v491_v62 = vsel %vm333_vm0, %v321_v16, -inf  ;;  %v325_v33 = vld [vmem:[%s942_s17 + $0xf0] sm:$0x3]  ;;  %v310_v0 = vld [vmem:[%s942_s17 + $0xd2] sm:$0x3] }
  0x64   : > { %773 = vst.msk [vmem:[%s1032_s27 + $0x2c] sm:$0x3] %vm333_vm0, %v742_v2  ;;  %v743_v6 = vmax.f32 %v698_v48, %v608_v3  ;;  %v700_v23 = vsel %vm333_vm0, %v612_v31, -inf  ;;  %v492_v10 = vmax.f32 %v490_v15, %v491_v62  ;;  %v493_v45 = vsel %vm333_vm0, %v306_v55, -inf  ;;  %v326_v28 = vld [vmem:[%s942_s17 + $0xf2] sm:$0x3] }
  0x65   : > { %v701_v50 = vmax.f32 %v699_v5, %v700_v23  ;;  %v613_v51 = vmax.f32 %v486_v38, %v1321_v30  ;;  %v614_v22 = vmax.f32 %v489_v42, %v1327_v39  ;;  %v494_v52 = vsel %vm333_vm0, %v322_v34, -inf  ;;  %v311_v24 = vld [vmem:[%s942_s17 + $0xd4] sm:$0x3]  ;;  %v312_v17 = vld [vmem:[%s942_s17 + $0xd6] sm:$0x3] }
  0x66   : > { %774 = vst.msk [vmem:[%s1032_s27 + $0x2e] sm:$0x3] %vm333_vm0, %v743_v6  ;;  %v495_v59 = vmax.f32 %v493_v45, %v494_v52  ;;  %v615_v8 = vmax.f32 %v492_v10, %v1341_v53  ;;  %v496_v41 = vsel %vm333_vm0, %v307_v21, -inf  ;;  %v497_v3 = vsel %vm333_vm0, %v323_v1, -inf  ;;  %v327_v18 = vld [vmem:[%s942_s17 + $0xf4] sm:$0x3] }
  0x67   : > { %775 = vst.msk [vmem:[%s1032_s27 + $0x30] sm:$0x3] %vm333_vm0, %v701_v50  ;;  %v702_v30 = vsel %vm333_vm0, %v613_v51, -inf  ;;  %v703_v39 = vsel %vm333_vm0, %v614_v22, -inf  ;;  %v498_v61 = vmax.f32 %v496_v41, %v497_v3  ;;  %v499_v63 = vsel %vm333_vm0, %v308_v46, -inf }
  0x68   : > { %v704_v53 = vmax.f32 %v702_v30, %v703_v39  ;;  %v616_v40 = vmax.f32 %v495_v59, %v1348_v58  ;;  %v705_v49 = vsel %vm333_vm0, %v615_v8, -inf  ;;  %v500_v35 = vsel %vm333_vm0, %v324_v19, -inf  ;;  %v328_v60 = vld [vmem:[%s942_s17 + $0xf6] sm:$0x3]  ;;  %v329_v5 = vld [vmem:[%s942_s17 + $0xf8] sm:$0x3] }
  0x69   : > { %v501_v12 = vmax.f32 %v499_v63, %v500_v35  ;;  %v617_v13 = vmax.f32 %v498_v61, %v1356_v4  ;;  %v502_v36 = vsel %vm333_vm0, %v309_v27, -inf  ;;  %v503_v20 = vsel %vm333_vm0, %v325_v33, -inf  ;;  %v314_v15 = vld [vmem:[%s942_s17 + $0xda] sm:$0x3]  ;;  %v315_v50 = vld [vmem:[%s942_s17 + $0xdc] sm:$0x3] }
  0x6a   : > { %v744_v44 = vmax.f32 %v704_v53, %v612_v31  ;;  %v706_v58 = vsel %vm333_vm0, %v616_v40, -inf  ;;  %v504_v57 = vmax.f32 %v502_v36, %v503_v20  ;;  %v505_v56 = vsel %vm333_vm0, %v310_v0, -inf  ;;  %v313_v31 = vld [vmem:[%s942_s17 + $0xd8] sm:$0x3]  ;;  %v330_v6 = vld [vmem:[%s942_s17 + $0xfa] sm:$0x3] }
  0x6b   : > { %v707_v16 = vmax.f32 %v705_v49, %v706_v58  ;;  %v618_v14 = vmax.f32 %v501_v12, %v1366_v47  ;;  %v708_v4 = vsel %vm333_vm0, %v617_v13, -inf  ;;  %v506_v26 = vsel %vm333_vm0, %v326_v28, -inf  ;;  %v331_v51 = vld [vmem:[%s942_s17 + $0xfc] sm:$0x3]  ;;  %v316_v59 = vld [vmem:[%s942_s17 + $0xde] sm:$0x3] }
  0x6c   : > { %776 = vst.msk [vmem:[%s1032_s27 + $0x32] sm:$0x3] %vm333_vm0, %v744_v44  ;;  %v507_v32 = vmax.f32 %v505_v56, %v506_v26  ;;  %v619_v55 = vmax.f32 %v504_v57, %v1383_v25  ;;  %v508_v2 = vsel %vm333_vm0, %v311_v24, -inf  ;;  %v509_v48 = vsel %vm333_vm0, %v327_v18, -inf  ;;  %v332_v27 = vld [vmem:[%s942_s17 + $0xfe] sm:$0x3] }
  0x6d   : > { %v745_v47 = vmax.f32 %v707_v16, %v614_v22  ;;  %v709_v34 = vsel %vm333_vm0, %v618_v14, -inf  ;;  %v510_v38 = vmax.f32 %v508_v2, %v509_v48  ;;  %v511_v42 = vsel %vm333_vm0, %v312_v17, -inf }
  0x6e   : > { %v710_v62 = vmax.f32 %v708_v4, %v709_v34  ;;  %v620_v21 = vmax.f32 %v507_v32, %v1386_v29  ;;  %v711_v25 = vsel %vm333_vm0, %v619_v55, -inf  ;;  %v512_v1 = vsel %vm333_vm0, %v328_v60, -inf }
  0x6f   : > { %777 = vst.msk [vmem:[%s1032_s27 + $0x34] sm:$0x3] %vm333_vm0, %v745_v47  ;;  %v513_v23 = vmax.f32 %v511_v42, %v512_v1  ;;  %v621_v10 = vmax.f32 %v510_v38, %v1397_v43  ;;  %v514_v45 = vsel %vm333_vm0, %v313_v31, -inf  ;;  %v515_v46 = vsel %vm333_vm0, %v329_v5, -inf }
  0x70   : > { %v746_v22 = vmax.f32 %v710_v62, %v616_v40  ;;  %v712_v29 = vsel %vm333_vm0, %v620_v21, -inf  ;;  %v516_v52 = vmax.f32 %v514_v45, %v515_v46  ;;  %v517_v19 = vsel %vm333_vm0, %v314_v15, -inf }
  0x71   : > { %v713_v8 = vmax.f32 %v711_v25, %v712_v29  ;;  %v622_v41 = vmax.f32 %v513_v23, %v1409_v11  ;;  %v714_v3 = vsel %vm333_vm0, %v621_v10, -inf  ;;  %v518_v43 = vsel %vm333_vm0, %v330_v6, -inf }
  0x72   : > { %778 = vst.msk [vmem:[%s1032_s27 + $0x36] sm:$0x3] %vm333_vm0, %v746_v22  ;;  %v519_v33 = vmax.f32 %v517_v19, %v518_v43  ;;  %v623_v30 = vmax.f32 %v516_v52, %v1422_v9  ;;  %v520_v39 = vsel %vm333_vm0, %v315_v50, -inf  ;;  %v521_v61 = vsel %vm333_vm0, %v331_v51, -inf }
  0x73   : > { %v747_v63 = vmax.f32 %v713_v8, %v618_v14  ;;  %v715_v0 = vsel %vm333_vm0, %v622_v41, -inf  ;;  %v522_v11 = vmax.f32 %v520_v39, %v521_v61  ;;  %v523_v53 = vsel %vm333_vm0, %v316_v59, -inf }
  0x74   : > { %v716_v40 = vmax.f32 %v714_v3, %v715_v0  ;;  %v624_v49 = vmax.f32 %v519_v33, %v1428_v54  ;;  %v717_v35 = vsel %vm333_vm0, %v623_v30, -inf  ;;  %v524_v9 = vsel %vm333_vm0, %v332_v27, -inf }
  0x75   : > { %779 = vst.msk [vmem:[%s1032_s27 + $0x38] sm:$0x3] %vm333_vm0, %v747_v63  ;;  %v525_v28 = vmax.f32 %v523_v53, %v524_v9  ;;  %v625_v12 = vmax.f32 %v522_v11, %v1436_v7 }
  0x76   : > { %v748_v13 = vmax.f32 %v716_v40, %v620_v21  ;;  %v718_v36 = vsel %vm333_vm0, %v624_v49, -inf }
  0x77   : > { %v719_v20 = vmax.f32 %v717_v35, %v718_v36  ;;  %v626_v24 = vmax.f32 %v525_v28, %v1447_v37  ;;  %v720_v18 = vsel %vm333_vm0, %v625_v12, -inf }
  0x78   : > { %780 = vst.msk [vmem:[%s1032_s27 + $0x3a] sm:$0x3] %vm333_vm0, %v748_v13 }
  0x79   : > { %v749_v54 = vmax.f32 %v719_v20, %v622_v41  ;;  %v721_v44 = vsel %vm333_vm0, %v626_v24, -inf }
  0x7a   : > { %v722_v58 = vmax.f32 %v720_v18, %v721_v44 }
  0x7b   : > { %781 = vst.msk [vmem:[%s1032_s27 + $0x3c] sm:$0x3] %vm333_vm0, %v749_v54 }
  0x7c   : > { %v750_v57 = vmax.f32 %v722_v58, %v624_v49 }
  0x7e   : > { %782 = vst.msk [vmem:[%s1032_s27 + $0x3e] sm:$0x3] %vm333_vm0, %v750_v57 }
  0x7f PF: > { %s12_s9 = sadd.s32 1, %s910_s9  }
  0x80   : > { %p9_p8 = scmp.ge.s32.totalorder %s12_s9, 4  }
  0x82   :  { %11 = sbr.rel (!%p9_p8) target bundleno = 1 (0x1), region = 62 }

</bundles_post_ra>
